<compile_context>
chip_gen: v5e
topology: v5e:2x2
jax: 0.10.0
libtpu: 0.0.40
codegen_flags: <defaults>
</compile_context>

<pallas_src>
import jax
import jax.numpy as jnp
from jax.experimental import pallas as pl
from jax.experimental.pallas import tpu as pltpu


def _copy_kernel(x_ref, o_ref):
    o_ref[...] = x_ref[...]


def squeeze_last_two(x):
    """Pallas equivalent of SqueezeLastTwo.forward: (B, C, 1, 1) -> (B, C)."""
    b, c = x.shape[0], x.shape[1]
    # x.view(B, C) is only valid when the trailing dims collapse to one element.
    assert x.shape[2] * x.shape[3] == 1, "last two dims must have size 1"

    # Pure metadata reshape (identical row-major layout; no HBM traffic).
    x2 = x.reshape(b, c)

    if c % 128 == 0:
        # Lane-dense channel tiling: pick the largest power-of-two tile that
        # divides C, capped at 1024 lanes, so every store is an unmasked
        # full-lane vst and VMEM usage stays tiny on all of v5e/v6e/v7x.
        tc = 128
        while tc * 2 <= min(c, 1024) and c % (tc * 2) == 0:
            tc *= 2
        grid = (c // tc,)
        return pl.pallas_call(
            _copy_kernel,
            out_shape=jax.ShapeDtypeStruct((b, c), x.dtype),
            grid_spec=pltpu.PrefetchScalarGridSpec(
                num_scalar_prefetch=0,
                grid=grid,
                in_specs=[pl.BlockSpec((b, tc), lambda j: (0, j))],
                out_specs=pl.BlockSpec((b, tc), lambda j: (0, j)),
            ),
            compiler_params=pltpu.CompilerParams(
                dimension_semantics=("parallel",)),
        )(x2)

    # Fallback: one block equal to the full array (legal regardless of (8,128)
    # alignment; fine for the small channel counts where this path triggers).
    return pl.pallas_call(
        _copy_kernel,
        out_shape=jax.ShapeDtypeStruct((b, c), x.dtype),
    )(x2)


if __name__ == "__main__":
    key = jax.random.PRNGKey(0)
    k1, k2 = jax.random.split(key)

    # Typical PACS usage: pooled features of shape (batch, channels, 1, 1).
    x = jax.random.normal(k1, (2, 256, 1, 1), jnp.float32)
    out = jax.block_until_ready(squeeze_last_two(x))
    assert out.shape == (2, 256), out.shape
    assert bool(jnp.array_equal(out, x.reshape(2, 256)))

    # The module exists specifically to be safe for batch size 1 — check that.
    x1 = jax.random.normal(k2, (1, 128, 1, 1), jnp.float32)
    out1 = jax.block_until_ready(squeeze_last_two(x1))
    assert out1.shape == (1, 128), out1.shape
    assert bool(jnp.array_equal(out1, x1.reshape(1, 128)))

    print("KERNEL_OK")
</pallas_src>

<mosaic_0001>
module attributes {stable_mosaic.version = 11 : i64} {
  func.func @_copy_kernel(%arg0: i32, %arg1: memref<2x256xf32, #tpu.memory_space<vmem>>, %arg2: memref<2x256xf32, #tpu.memory_space<vmem>>) attributes {dimension_semantics = [#tpu.dimension_semantics<parallel>], iteration_bounds = array<i64: 1>, scalar_prefetch = 0 : i64, scratch_operands = 0 : i64, tpu.core_type = #tpu.core_type<tc>, window_params = [{transform_indices = @transform_0, window_bounds = array<i64: 2, 256>}, {transform_indices = @transform_1, window_bounds = array<i64: 2, 256>}]} {
    %c0 = arith.constant 0 : index
    %c0_0 = arith.constant 0 : index
    %0 = vector.load %arg1[%c0, %c0_0] : memref<2x256xf32, #tpu.memory_space<vmem>>, vector<2x256xf32>
    %c0_1 = arith.constant 0 : index
    %c0_2 = arith.constant 0 : index
    %1 = vector.load %arg2[%c0_1, %c0_2] : memref<2x256xf32, #tpu.memory_space<vmem>>, vector<2x256xf32>
    tpu.vector_store %arg2[%c0_1, %c0_2], %0 {strides = array<i32>} : memref<2x256xf32, #tpu.memory_space<vmem>>, vector<2x256xf32>,
    return
  }
  func.func @transform_0(%arg0: i32) -> (i32, i32) {
    %c0_i32 = arith.constant 0 : i32
    %c0_i32_0 = arith.constant 0 : i32
    return %c0_i32, %arg0 : i32, i32
  }
  func.func @transform_1(%arg0: i32) -> (i32, i32) {
    %c0_i32 = arith.constant 0 : i32
    %c0_i32_0 = arith.constant 0 : i32
    return %c0_i32, %arg0 : i32, i32
  }
}

</mosaic_0001>

<bundles_post_ra>
// kernel: tpu_custom_call.1
= control target key start
LH: loop header
LB: loop body
LE: loop exit
PB: predicated region body
PF: predicated region fallthrough
CT: control target
= control target key end

     0   :  { %6 = vsyncpa [#allocation3], 0  ;;  %s114_s0 = inlined_call_operand.hbm [shape: f32[2,256], index: 0, kind: input, shape index: {}]   ;;  %s115_s1 = inlined_call_operand.hbm [shape: f32[2,256], index: 1, kind: output, shape index: {}]  }
   0x1   :  { %7 = vsyncpa [#allocation4], 0  ;;  %s13_s8 = sshll.u32 %s114_s0, 4  ;;  %s96_s9 = smov [#allocation2]   ;;  %s14_s8 = int_to_ptr.hbm [resolvable:$true] %s13_s8 }
   0x2   :  { %s15_s10 = sshll.u32 %s96_s9, 4  ;;  %s16_s10 = int_to_ptr.vmem [resolvable:$true] %s15_s10 }
   0x3   :  { %18 = dma.hbm_to_vmem [thread:$0]  %s14_s8, 64, %s16_s10, [#allocation3]  }
   0x4   :  { %92 = dma.done.wait [#allocation3], 64  }
   0x5   :  { %93 = vsyncadd [#allocation3], 4294967232  ;;  %s97_s11 = smov [#allocation5]   ;;  %s32_s15 = sshll.u32 %s115_s1, 4  ;;  %v23_v0 = vld [vmem:[#allocation2] sm:$0xf]  ;;  %s33_s15 = int_to_ptr.hbm [resolvable:$true] %s32_s15 }
   0x6   :  { %s30_s12 = sshll.u32 %s97_s11, 4  ;;  %24 = vst [vmem:[#allocation5] sm:$0xf] %v23_v0  ;;  %s31_s12 = int_to_ptr.vmem [resolvable:$true] %s30_s12 }
   0x7   :  { %35 = dma.vmem_to_hbm [thread:$0]  %s31_s12, 64, %s33_s15, [#allocation4]  }
   0x8   :  { %94 = dma.done.wait [#allocation4], 64  }
   0x9   :  { %95 = vsyncadd [#allocation4], 4294967232 }
   0xa   :  { %40 = vsyncpa [#allocation3], 1 }
   0xb   :  { %41 = vsyncpa [#allocation4], 1 }

</bundles_post_ra>
